<compile_context>
chip_gen: v7x
topology: tpu7x:2x2x1
jax: 0.10.0
libtpu: 0.0.40
codegen_flags: <defaults>
</compile_context>

<pallas_src>
import functools

import jax
import jax.numpy as jnp
from jax.experimental import pallas as pl
from jax.experimental.pallas import tpu as pltpu

LANE = 128
SUBLANE = 8


def _round_up(n, m):
    return pl.cdiv(n, m) * m


def _vmem_ceiling_bytes():
    """Physical VMEM minus headroom for compiler scratch / pipeline buffers."""
    try:
        cap = pltpu.get_tpu_info().vmem_capacity_bytes
    except Exception:  # pragma: no cover - conservative fallback
        cap = 64 << 20
    return cap - max(8 << 20, cap // 8)


def mlp_kernel(x_ref, w_in_ref, b_in_ref, wh_ref, bh_ref, w_out_t_ref, b_out_ref,
               out_ref, *, n_hidden):
    """Full MLP forward for one batch tile, entirely in VMEM.

    x_ref:       (tile_b, d_in)        bf16   (d_in unpadded: full-last-dim block)
    w_in_ref:    (d_in, H_p)           bf16   b_in_ref:  (1, H_p)   f32
    wh_ref:      (n_stack, H_p, H_p)   bf16   bh_ref:    (n_stack, 1, H_p) f32
    w_out_t_ref: (8, H_p)              bf16   b_out_ref: (8, 1)     f32
    out_ref:     (8, tile_b)           f32    (transposed; only row 0 is real)

    Padded weight rows/cols and bias entries are zero and ReLU(0)==0, so padded
    lanes stay exactly zero and never leak into real outputs.
    """
    # input block: Linear + ReLU (bf16 operands, f32 accumulation on the MXU)
    h = jnp.dot(x_ref[...], w_in_ref[...], preferred_element_type=jnp.float32)
    h = jnp.maximum(h + b_in_ref[...], 0.0)

    # hidden layers: Linear + ReLU (static unroll; n_hidden is compile-time)
    for i in range(n_hidden):
        h = jnp.dot(h.astype(jnp.bfloat16), wh_ref[i],
                    preferred_element_type=jnp.float32)
        h = jnp.maximum(h + bh_ref[i], 0.0)

    # output block: Linear, no activation, computed directly in transposed form
    #   (8, H_p) x (tile_b, H_p)^T -> (8, tile_b)
    # so the store is a small lane-dense block instead of a (tile_b, 128) slab.
    y_t = jax.lax.dot_general(
        w_out_t_ref[...], h.astype(jnp.bfloat16),
        dimension_numbers=(((1,), (1,)), ((), ())),
        preferred_element_type=jnp.float32)
    out_ref[...] = (y_t + b_out_ref[...]).astype(out_ref.dtype)


def prepare_params(params):
    """Pad feature dims to the 128-lane granule (output dim only to 8 sublanes,
    stored transposed); cast matmul operands to bf16 (biases stay f32)."""
    w_in, b_in, wh, bh, w_out, b_out = params
    d_in, H = w_in.shape
    n_hidden = wh.shape[0]
    out_dim = w_out.shape[1]

    h_p = _round_up(H, LANE)
    out_p8 = _round_up(out_dim, SUBLANE)
    n_stack = max(n_hidden, 1)

    w_in_p = jnp.zeros((d_in, h_p), jnp.bfloat16).at[:, :H].set(
        w_in.astype(jnp.bfloat16))
    b_in_p = jnp.zeros((1, h_p), jnp.float32).at[:, :H].set(b_in)

    wh_p = jnp.zeros((n_stack, h_p, h_p), jnp.bfloat16)
    bh_p = jnp.zeros((n_stack, 1, h_p), jnp.float32)
    if n_hidden:
        wh_p = wh_p.at[:n_hidden, :H, :H].set(wh.astype(jnp.bfloat16))
        bh_p = bh_p.at[:n_hidden, :, :H].set(bh)

    w_out_t_p = jnp.zeros((out_p8, h_p), jnp.bfloat16).at[:out_dim, :H].set(
        w_out.T.astype(jnp.bfloat16))
    b_out_p = jnp.zeros((out_p8, 1), jnp.float32).at[:out_dim, :].set(b_out.T)
    return w_in_p, b_in_p, wh_p, bh_p, w_out_t_p, b_out_p


def _mlp_forward_impl(x, padded, *, out_dim, n_hidden, max_tile_b):
    w_in_p, b_in_p, wh_p, bh_p, w_out_t_p, b_out_p = padded
    B, d_in = x.shape
    d_in_w, h_p = w_in_p.shape
    assert d_in == d_in_w, "input feature dim mismatch with prepared params"
    out_p8 = w_out_t_p.shape[0]
    n_stack = wh_p.shape[0]

    # Batch tile: whole batch in one grid step when small; otherwise split ~evenly
    # into <=max_tile_b tiles (128-aligned so the transposed output store stays
    # lane-dense).  max_tile_b=256 keeps >=2 grid steps available for v7x's 2 TCs.
    if B <= max_tile_b:
        tile_b = _round_up(B, SUBLANE)
    else:
        n_tiles = pl.cdiv(B, max_tile_b)
        tile_b = _round_up(pl.cdiv(B, n_tiles), LANE)
    b_pad = _round_up(B, tile_b)
    grid_n = b_pad // tile_b

    # Row-pad + bf16 cast of x happens inside the same jit as the pallas_call.
    x_p = x.astype(jnp.bfloat16)
    if b_pad != B:
        x_p = jnp.zeros((b_pad, d_in), jnp.bfloat16).at[:B].set(x_p)

    # VMEM budgeting: raise the scoped limit only when resident weights need it,
    # with a ceiling derived from the chip's actual VMEM minus headroom.
    resident = sum(int(a.size) * a.dtype.itemsize for a in padded)
    streamed = tile_b * d_in * 2 + out_p8 * tile_b * 4
    need = 2 * (resident + streamed)  # conservative: everything double-buffered
    vmem_limit = None
    if need > (12 << 20):
        vmem_limit = min(need + (4 << 20), _vmem_ceiling_bytes())

    flops = 2 * b_pad * (d_in * h_p + n_hidden * h_p * h_p + h_p * out_p8)
    bytes_accessed = b_pad * d_in * 2 + resident + out_p8 * b_pad * 4
    cost = pl.CostEstimate(flops=flops, transcendentals=0,
                           bytes_accessed=bytes_accessed)

    kernel = functools.partial(mlp_kernel, n_hidden=n_hidden)

    in_specs = [
        pl.BlockSpec((tile_b, d_in), lambda i: (i, 0)),            # x tile (lane = d_in, full dim)
        pl.BlockSpec((d_in, h_p), lambda i: (0, 0)),               # w_in (resident)
        pl.BlockSpec((1, h_p), lambda i: (0, 0)),                  # b_in
        pl.BlockSpec((n_stack, h_p, h_p), lambda i: (0, 0, 0)),    # hidden W stack
        pl.BlockSpec((n_stack, 1, h_p), lambda i: (0, 0, 0)),      # hidden b stack
        pl.BlockSpec((out_p8, h_p), lambda i: (0, 0)),             # w_out^T
        pl.BlockSpec((out_p8, 1), lambda i: (0, 0)),               # b_out^T
    ]
    out_specs = pl.BlockSpec((out_p8, tile_b), lambda i: (0, i))   # transposed, lane-dense

    y_t = pl.pallas_call(
        kernel,
        out_shape=jax.ShapeDtypeStruct((out_p8, b_pad), jnp.float32),
        grid_spec=pltpu.PrefetchScalarGridSpec(
            num_scalar_prefetch=0,
            grid=(grid_n,),
            in_specs=in_specs,
            out_specs=out_specs,
        ),
        compiler_params=pltpu.CompilerParams(
            dimension_semantics=("parallel",),
            vmem_limit_bytes=vmem_limit,
        ),
        cost_estimate=cost,
    )(x_p, w_in_p, b_in_p, wh_p, bh_p, w_out_t_p, b_out_p)

    y = y_t[:out_dim, :B].T                 # (B, out_dim), out_dim == 1
    # PyTorch forward (explain_mode=False) returns (x, torch.zeros_like(x)); the
    # zeros are a compile-time constant, so they are produced here instead of
    # burning a kernel store / output DMA stream on them.
    return y, jnp.zeros_like(y)


def make_mlp_forward(params, *, max_tile_b=256):
    """Pad/cast the params ONCE and return a jitted forward(x) closure."""
    padded = prepare_params(params)
    out_dim = params[4].shape[1]
    n_hidden = int(params[2].shape[0])

    @jax.jit
    def forward(x):
        return _mlp_forward_impl(x, padded, out_dim=out_dim, n_hidden=n_hidden,
                                 max_tile_b=max_tile_b)

    return forward


def init_params(key, input_dim, hidden_dim, n_hidden):
    """nn.Linear-style init (uniform +/- 1/sqrt(fan_in)); W stored as (in, out)."""
    keys = jax.random.split(key, 2 * (n_hidden + 2))

    def linear(kw, kb, fan_in, fan_out):
        bound = 1.0 / jnp.sqrt(fan_in)
        w = jax.random.uniform(kw, (fan_in, fan_out), jnp.float32, -bound, bound)
        b = jax.random.uniform(kb, (1, fan_out), jnp.float32, -bound, bound)
        return w, b

    w_in, b_in = linear(keys[0], keys[1], input_dim, hidden_dim)

    if n_hidden:
        wh_list, bh_list = [], []
        for j in range(n_hidden):
            w, b = linear(keys[2 + 2 * j], keys[3 + 2 * j], hidden_dim, hidden_dim)
            wh_list.append(w)
            bh_list.append(b)
        wh = jnp.stack(wh_list, axis=0)      # (n_hidden, H, H)
        bh = jnp.stack(bh_list, axis=0)      # (n_hidden, 1, H)
    else:
        wh = jnp.zeros((0, hidden_dim, hidden_dim), jnp.float32)
        bh = jnp.zeros((0, 1, hidden_dim), jnp.float32)

    w_out, b_out = linear(keys[-2], keys[-1], hidden_dim, 1)
    return w_in, b_in, wh, bh, w_out, b_out


def mlp_reference(x, params):
    """Pure-JAX f32 reference matching the PyTorch module semantics."""
    w_in, b_in, wh, bh, w_out, b_out = params
    h = jnp.maximum(x @ w_in + b_in, 0.0)
    for i in range(wh.shape[0]):
        h = jnp.maximum(h @ wh[i] + bh[i], 0.0)
    y = h @ w_out + b_out
    return y, jnp.zeros_like(y)


if __name__ == "__main__":
    batch, input_dim, hidden_dim, n_hidden = 16, 32, 32, 2

    key = jax.random.PRNGKey(0)
    kx, kp = jax.random.split(key)
    x = jax.random.normal(kx, (batch, input_dim), jnp.float32)
    params = init_params(kp, input_dim, hidden_dim, n_hidden)

    forward = make_mlp_forward(params)
    out, zeros = forward(x)
    out = jax.block_until_ready(out)
    zeros = jax.block_until_ready(zeros)

    ref_out, ref_zeros = mlp_reference(x, params)
    assert out.shape == (batch, 1) and zeros.shape == (batch, 1)
    # bf16 matmul operands (f32 accumulation) -> loosened tolerance vs f32 reference.
    assert jnp.allclose(out, ref_out, atol=5e-2, rtol=5e-2)
    assert jnp.all(zeros == 0.0)

    print("KERNEL_OK")
</pallas_src>

<mosaic_0001>
module attributes {stable_mosaic.version = 11 : i64} {
  func.func @mlp_kernel(%arg0: i32, %arg1: memref<16x32xbf16, #tpu.memory_space<vmem>>, %arg2: memref<32x128xbf16, #tpu.memory_space<vmem>>, %arg3: memref<1x128xf32, #tpu.memory_space<vmem>>, %arg4: memref<2x128x128xbf16, #tpu.memory_space<vmem>>, %arg5: memref<2x1x128xf32, #tpu.memory_space<vmem>>, %arg6: memref<8x128xbf16, #tpu.memory_space<vmem>>, %arg7: memref<8x1xf32, #tpu.memory_space<vmem>>, %arg8: memref<8x16xf32, #tpu.memory_space<vmem>>) attributes {dimension_semantics = [#tpu.dimension_semantics<parallel>], iteration_bounds = array<i64: 1>, scalar_prefetch = 0 : i64, scratch_operands = 0 : i64, tpu.core_type = #tpu.core_type<tc>, window_params = [{transform_indices = @transform_0, window_bounds = array<i64: 16, 32>}, {pipeline_mode = #tpu.pipeline_mode<synchronous>, transform_indices = @transform_1, window_bounds = array<i64: 32, 128>}, {pipeline_mode = #tpu.pipeline_mode<synchronous>, transform_indices = @transform_2, window_bounds = array<i64: 1, 128>}, {pipeline_mode = #tpu.pipeline_mode<synchronous>, transform_indices = @transform_3, window_bounds = array<i64: 2, 128, 128>}, {pipeline_mode = #tpu.pipeline_mode<synchronous>, transform_indices = @transform_4, window_bounds = array<i64: 2, 1, 128>}, {pipeline_mode = #tpu.pipeline_mode<synchronous>, transform_indices = @transform_5, window_bounds = array<i64: 8, 128>}, {pipeline_mode = #tpu.pipeline_mode<synchronous>, transform_indices = @transform_6, window_bounds = array<i64: 8, 1>}, {transform_indices = @transform_7, window_bounds = array<i64: 8, 16>}]} {
    %c0 = arith.constant 0 : index
    %c0_0 = arith.constant 0 : index
    %0 = vector.load %arg1[%c0, %c0_0] : memref<16x32xbf16, #tpu.memory_space<vmem>>, vector<16x32xbf16>
    %c0_1 = arith.constant 0 : index
    %c0_2 = arith.constant 0 : index
    %1 = vector.load %arg2[%c0_1, %c0_2] : memref<32x128xbf16, #tpu.memory_space<vmem>>, vector<32x128xbf16>
    %cst = arith.constant dense<0.000000e+00> : vector<16x128xf32>
    %2 = tpu.matmul %0, %1, %cst {dimension_numbers = #tpu.dot_dimension_numbers<[1], [0], [0], [1], [0, 0, 1, 1], [], []>} : vector<16x32xbf16>, vector<32x128xbf16>, vector<16x128xf32> -> vector<16x128xf32>
    %c0_3 = arith.constant 0 : index
    %c0_4 = arith.constant 0 : index
    %3 = vector.load %arg3[%c0_3, %c0_4] : memref<1x128xf32, #tpu.memory_space<vmem>>, vector<1x128xf32>
    %4 = vector.broadcast %3 : vector<1x128xf32> to vector<16x128xf32>
    %5 = arith.addf %2, %4 : vector<16x128xf32>
    %cst_5 = arith.constant 0.000000e+00 : f32
    %6 = vector.broadcast %cst_5 : f32 to vector<16x128xf32>
    %7 = arith.maximumf %5, %6 : vector<16x128xf32>
    %8 = arith.truncf %7 : vector<16x128xf32> to vector<16x128xbf16>
    %c0_6 = arith.constant 0 : index
    %c0_7 = arith.constant 0 : index
    %c0_8 = arith.constant 0 : index
    %9 = vector.load %arg4[%c0_6, %c0_7, %c0_8] : memref<2x128x128xbf16, #tpu.memory_space<vmem>>, vector<1x128x128xbf16>
    %10 = vector.shape_cast %9 : vector<1x128x128xbf16> to vector<128x128xbf16>
    %cst_9 = arith.constant dense<0.000000e+00> : vector<16x128xf32>
    %11 = tpu.matmul %8, %10, %cst_9 {dimension_numbers = #tpu.dot_dimension_numbers<[1], [0], [0], [1], [0, 0, 1, 1], [], []>} : vector<16x128xbf16>, vector<128x128xbf16>, vector<16x128xf32> -> vector<16x128xf32>
    %c0_10 = arith.constant 0 : index
    %c0_11 = arith.constant 0 : index
    %c0_12 = arith.constant 0 : index
    %12 = vector.load %arg5[%c0_10, %c0_11, %c0_12] : memref<2x1x128xf32, #tpu.memory_space<vmem>>, vector<1x1x128xf32>
    %13 = vector.shape_cast %12 : vector<1x1x128xf32> to vector<1x128xf32>
    %14 = vector.broadcast %13 : vector<1x128xf32> to vector<16x128xf32>
    %15 = arith.addf %11, %14 : vector<16x128xf32>
    %cst_13 = arith.constant 0.000000e+00 : f32
    %16 = vector.broadcast %cst_13 : f32 to vector<16x128xf32>
    %17 = arith.maximumf %15, %16 : vector<16x128xf32>
    %18 = arith.truncf %17 : vector<16x128xf32> to vector<16x128xbf16>
    %c1 = arith.constant 1 : index
    %c0_14 = arith.constant 0 : index
    %c0_15 = arith.constant 0 : index
    %19 = vector.load %arg4[%c1, %c0_14, %c0_15] : memref<2x128x128xbf16, #tpu.memory_space<vmem>>, vector<1x128x128xbf16>
    %20 = vector.shape_cast %19 : vector<1x128x128xbf16> to vector<128x128xbf16>
    %cst_16 = arith.constant dense<0.000000e+00> : vector<16x128xf32>
    %21 = tpu.matmul %18, %20, %cst_16 {dimension_numbers = #tpu.dot_dimension_numbers<[1], [0], [0], [1], [0, 0, 1, 1], [], []>} : vector<16x128xbf16>, vector<128x128xbf16>, vector<16x128xf32> -> vector<16x128xf32>
    %c1_17 = arith.constant 1 : index
    %c0_18 = arith.constant 0 : index
    %c0_19 = arith.constant 0 : index
    %22 = vector.load %arg5[%c1_17, %c0_18, %c0_19] : memref<2x1x128xf32, #tpu.memory_space<vmem>>, vector<1x1x128xf32>
    %23 = vector.shape_cast %22 : vector<1x1x128xf32> to vector<1x128xf32>
    %24 = vector.broadcast %23 : vector<1x128xf32> to vector<16x128xf32>
    %25 = arith.addf %21, %24 : vector<16x128xf32>
    %cst_20 = arith.constant 0.000000e+00 : f32
    %26 = vector.broadcast %cst_20 : f32 to vector<16x128xf32>
    %27 = arith.maximumf %25, %26 : vector<16x128xf32>
    %c0_21 = arith.constant 0 : index
    %c0_22 = arith.constant 0 : index
    %28 = vector.load %arg6[%c0_21, %c0_22] : memref<8x128xbf16, #tpu.memory_space<vmem>>, vector<8x128xbf16>
    %29 = arith.truncf %27 : vector<16x128xf32> to vector<16x128xbf16>
    %cst_23 = arith.constant dense<0.000000e+00> : vector<8x16xf32>
    %30 = tpu.matmul %28, %29, %cst_23 {dimension_numbers = #tpu.dot_dimension_numbers<[1], [1], [0], [0], [0, 0, 1, 0], [], []>} : vector<8x128xbf16>, vector<16x128xbf16>, vector<8x16xf32> -> vector<8x16xf32>
    %c0_24 = arith.constant 0 : index
    %c0_25 = arith.constant 0 : index
    %31 = vector.load %arg7[%c0_24, %c0_25] : memref<8x1xf32, #tpu.memory_space<vmem>>, vector<8x1xf32>
    %32 = vector.broadcast %31 : vector<8x1xf32> to vector<8x16xf32>
    %33 = arith.addf %30, %32 : vector<8x16xf32>
    %c0_26 = arith.constant 0 : index
    %c0_27 = arith.constant 0 : index
    %34 = vector.load %arg8[%c0_26, %c0_27] : memref<8x16xf32, #tpu.memory_space<vmem>>, vector<8x16xf32>
    tpu.vector_store %arg8[%c0_26, %c0_27], %33 {strides = array<i32>} : memref<8x16xf32, #tpu.memory_space<vmem>>, vector<8x16xf32>,
    return
  }
  func.func @transform_0(%arg0: i32) -> (i32, i32) {
    %c0_i32 = arith.constant 0 : i32
    %c0_i32_0 = arith.constant 0 : i32
    return %arg0, %c0_i32 : i32, i32
  }
  func.func @transform_1(%arg0: i32) -> (i32, i32) {
    %c0_i32 = arith.constant 0 : i32
    %c0_i32_0 = arith.constant 0 : i32
    %c0_i32_1 = arith.constant 0 : i32
    return %c0_i32, %c0_i32_0 : i32, i32
  }
  func.func @transform_2(%arg0: i32) -> (i32, i32) {
    %c0_i32 = arith.constant 0 : i32
    %c0_i32_0 = arith.constant 0 : i32
    %c0_i32_1 = arith.constant 0 : i32
    return %c0_i32, %c0_i32_0 : i32, i32
  }
  func.func @transform_3(%arg0: i32) -> (i32, i32, i32) {
    %c0_i32 = arith.constant 0 : i32
    %c0_i32_0 = arith.constant 0 : i32
    %c0_i32_1 = arith.constant 0 : i32
    %c0_i32_2 = arith.constant 0 : i32
    return %c0_i32, %c0_i32_0, %c0_i32_1 : i32, i32, i32
  }
  func.func @transform_4(%arg0: i32) -> (i32, i32, i32) {
    %c0_i32 = arith.constant 0 : i32
    %c0_i32_0 = arith.constant 0 : i32
    %c0_i32_1 = arith.constant 0 : i32
    %c0_i32_2 = arith.constant 0 : i32
    return %c0_i32, %c0_i32_0, %c0_i32_1 : i32, i32, i32
  }
  func.func @transform_5(%arg0: i32) -> (i32, i32) {
    %c0_i32 = arith.constant 0 : i32
    %c0_i32_0 = arith.constant 0 : i32
    %c0_i32_1 = arith.constant 0 : i32
    return %c0_i32, %c0_i32_0 : i32, i32
  }
  func.func @transform_6(%arg0: i32) -> (i32, i32) {
    %c0_i32 = arith.constant 0 : i32
    %c0_i32_0 = arith.constant 0 : i32
    %c0_i32_1 = arith.constant 0 : i32
    return %c0_i32, %c0_i32_0 : i32, i32
  }
  func.func @transform_7(%arg0: i32) -> (i32, i32) {
    %c0_i32 = arith.constant 0 : i32
    %c0_i32_0 = arith.constant 0 : i32
    return %c0_i32, %arg0 : i32, i32
  }
}

</mosaic_0001>

<bundles_post_ra>
// kernel: forward.1
= control target key start
LH: loop header
LB: loop body
LE: loop exit
PB: predicated region body
PF: predicated region fallthrough
CT: control target
= control target key end

     0   :  { %12 = vsyncpa [#allocation3], 0  ;;  %s556_s24 = smov [#allocation2]   ;;  %s668_s0 = inlined_call_operand.vmem [shape: bf16[16,32], index: 0, kind: input, shape index: {}]   ;;  %s669_s1 = inlined_call_operand.vmem [shape: bf16[32,128], index: 1, kind: input, shape index: {}]   ;;  %s670_s2 = inlined_call_operand.vmem [shape: f32[1,128], index: 2, kind: input, shape index: {}]   ;;  %s671_s3 = inlined_call_operand.hbm [shape: bf16[2,128,128], index: 3, kind: input, shape index: {}]   ;;  %s672_s4 = inlined_call_operand.vmem [shape: f32[2,1,128], index: 4, kind: input, shape index: {}]   ;;  %s673_s5 = inlined_call_operand.vmem [shape: bf16[8,128], index: 5, kind: input, shape index: {}]   ;;  %s674_s6 = inlined_call_operand.vmem [shape: f32[8,1], index: 6, kind: input, shape index: {}]   ;;  %s675_s7 = inlined_call_operand.vmem [shape: f32[8,16], index: 7, kind: output, shape index: {}]  }
   0x1   :  { %s24_s25 = sshll.u32 %s556_s24, 4  ;;  %s532_s28 = scalar_lea.hbm %s671_s3, 2048  ;;  %s25_s25 = int_to_ptr.vmem [resolvable:$true] %s24_s25 }
   0x2   :  { %p533_p0 = scmp.ne.s32.totalorder %s671_s3, %s532_s28  ;;  %p536_p1 = scmp.lt.u32.totalorder %s532_s28, %s671_s3 }
   0x4   :  { %p538_p2 = pnand %p536_p1, %p533_p0 }
   0x6   :  { %541 = shalt.err (!%p538_p2)
}
   0x7   :  { %s542_s10 = scalar_lea.vmem %s25_s25, 2048  ;;  %p547_p4 = scmp.lt.s32.totalorder %s25_s25, %s25_s25 }
   0x8   :  { %p543_p3 = scmp.ne.s32.totalorder %s25_s25, %s542_s10  ;;  %p548_p5 = scmp.lt.s32.totalorder %s542_s10, %s542_s10 }
   0xa   :  { %p549_p6 = por %p548_p5, %p547_p4 }
   0xc   :  { %p550_p7 = pnand %p549_p6, %p543_p3 }
   0xe   :  { %553 = shalt.err (!%p550_p7)
}
   0xf   :  { %s557_s11 = smov 64   ;;  %s558_s12 = smov 4  }
  0x10   :  { %30 = dma.hbm_to_vmem [thread:$0]  %s671_s3, 2048, %s25_s25, [#allocation3], %s557_s11, %s557_s11, %s558_s12  }
  0x11   :  { %554 = dma.done.wait [#allocation3], 2048  }
  0x12   :  { %555 = vsyncadd [#allocation3], 4294965248  ;;  %v559_v0 = vmov 0.0   ;;  %vm560_vm0 = vmmov 0   ;;  %v513_v1 = vld [vmem:[%s669_s1] sm:$0xff]   ;;  %v514_v2 = vld [vmem:[%s669_s1 + $0x8] sm:$0xff]  }
  0x13   :  { %452 = vmatprep.subr.bf16.mxu0 %v559_v0  ;;  %456 = vmatprep.mubr.msk.bf16.mxu0 %vm560_vm0, %v559_v0  ;;  %v516_v3 = vld [vmem:[#allocation2] sm:$0xff]   ;;  %v515_v4 = vld [vmem:[%s668_s0] sm:$0xff]   ;;  %v517_v5 = vld [vmem:[#allocation2 + $0x8] sm:$0xff]   ;;  %vm71_vm1 = vcmask 261120   ;;  %v561_v41 = vmov 0   ;;  %vm398_vm2 = vcmask 130048  }
  0x14   :  { %460 = vmatprep.subr.bf16.mxu1 %v559_v0  ;;  %476 = vmatprep.mubr.msk.bf16.mxu1 %vm560_vm0, %v559_v0  ;;  %v518_v6 = vld [vmem:[#allocation2 + $0x10] sm:$0xff]   ;;  %v519_v7 = vld [vmem:[#allocation2 + $0x18] sm:$0xff]   ;;  %v520_v8 = vld [vmem:[#allocation2 + $0x20] sm:$0xff]  }
  0x15   :  { %453 = vmatpush3.bf16.msra.mxu0 %v513_v1  ;;  %461 = vmatpush3.bf16.msra.mxu1 %v516_v3  ;;  %v521_v9 = vld [vmem:[#allocation2 + $0x28] sm:$0xff]   ;;  %v522_v10 = vld [vmem:[#allocation2 + $0x30] sm:$0xff]   ;;  %v523_v11 = vld [vmem:[#allocation2 + $0x38] sm:$0xff]  }
  0x16   :  { %454 = vmatprep.subr.bf16.mxu0 %v559_v0  ;;  %462 = vmatprep.subr.bf16.mxu1 %v559_v0  ;;  %v524_v12 = vld [vmem:[#allocation2 + $0x40] sm:$0xff]   ;;  %v525_v13 = vld [vmem:[#allocation2 + $0x48] sm:$0xff]   ;;  %v526_v14 = vld [vmem:[#allocation2 + $0x50] sm:$0xff]  }
  0x17   :  { %v527_v15 = vld [vmem:[#allocation2 + $0x58] sm:$0xff]   ;;  %v528_v16 = vld [vmem:[#allocation2 + $0x60] sm:$0xff]   ;;  %v529_v17 = vld [vmem:[#allocation2 + $0x68] sm:$0xff]   ;;  %512 = vset.pattern.permute.xlu0 %v561_v41 }
  0x18   :  { %v405_v18 = vld [vmem:[%s670_s2] ss:$0 sm:$0xff]  ;;  %v530_v28 = vld [vmem:[#allocation2 + $0x70] sm:$0xff]   ;;  %v420_v42 = vld [vmem:[%s672_s4 + $0x1] ss:$0 sm:$0xff] }
  0x19   :  { %455 = vmatpush3.bf16.msra.mxu0 %v514_v2  ;;  %463 = vmatpush3.bf16.msra.mxu1 %v517_v5  ;;  %v531_v29 = vld [vmem:[#allocation2 + $0x78] sm:$0xff]  }
  0x1a   :  { %480 = vmatprep.subr.bf16.mxu0 %v559_v0  ;;  %464 = vmatprep.subr.bf16.mxu1 %v559_v0  ;;  %v410_v30 = vld [vmem:[%s672_s4] ss:$0 sm:$0xff] }
  0x1b   :  { %v352_v40 = vld [vmem:[%s674_s6] sm:$0xff] }
  0x1c   :  { %457 = vmatmul.mubr.msk.bf16.vlgmr.msra.gmra.mrb[0].mxu0 %vm71_vm1, %v515_v4  ;;  %355 = vperm.xlu0 %512, %v352_v40   ;;  %v350_v52 = vld [vmem:[%s673_s5] sm:$0xf] }
  0x1d   :  { %496 = vmatprep.mubr.msk.bf16.mxu0 %vm560_vm0, %v559_v0  ;;  %465 = vmatpush3.bf16.msra.mxu1 %v518_v6 }
  0x1e   :  { %466 = vmatprep.subr.bf16.mxu1 %v559_v0  ;;  %481 = vmatpush3.bf16.msra.mxu0 %v524_v12 }
  0x1f   :  { %482 = vmatprep.subr.bf16.mxu0 %v559_v0 }
  0x21   :  { %467 = vmatpush3.bf16.msra.mxu1 %v519_v7 }
  0x22   :  { %468 = vmatprep.subr.bf16.mxu1 %v559_v0  ;;  %483 = vmatpush3.bf16.msra.mxu0 %v525_v13 }
  0x23   :  { %484 = vmatprep.subr.bf16.mxu0 %v559_v0 }
  0x25   :  { %469 = vmatpush3.bf16.msra.mxu1 %v520_v8 }
  0x26   :  { %470 = vmatprep.subr.bf16.mxu1 %v559_v0  ;;  %485 = vmatpush3.bf16.msra.mxu0 %v526_v14 }
  0x27   :  { %486 = vmatprep.subr.bf16.mxu0 %v559_v0 }
  0x29   :  { %471 = vmatpush3.bf16.msra.mxu1 %v521_v9 }
  0x2a   :  { %472 = vmatprep.subr.bf16.mxu1 %v559_v0  ;;  %487 = vmatpush3.bf16.msra.mxu0 %v527_v15 }
  0x2b   :  { %488 = vmatprep.subr.bf16.mxu0 %v559_v0 }
  0x2d   :  { %473 = vmatpush3.bf16.msra.mxu1 %v522_v10 }
  0x2e   :  { %474 = vmatprep.subr.bf16.mxu1 %v559_v0  ;;  %489 = vmatpush3.bf16.msra.mxu0 %v528_v16 }
  0x2f   :  { %490 = vmatprep.subr.bf16.mxu0 %v559_v0 }
  0x31   :  { %475 = vmatpush3.bf16.msra.mxu1 %v523_v11 }
  0x32   :  { %500 = vmatprep.subr.bf16.mxu1 %v559_v0  ;;  %491 = vmatpush3.bf16.msra.mxu0 %v529_v17 }
  0x33   :  { %492 = vmatprep.subr.bf16.mxu0 %v559_v0 }
  0x36   :  { %493 = vmatpush3.bf16.msra.mxu0 %v530_v28 }
  0x37   :  { %494 = vmatprep.subr.bf16.mxu0 %v559_v0 }
  0x3a   :  { %495 = vmatpush3.bf16.msra.mxu0 %v531_v29 }
  0x9b   :  { %v356_v53 = vpop.permute.xlu0 %355 }
  0xef   :  { %v109_v19 = vpop.f32.mrb[0].mxu0 }
  0xf0   :  { %v110_v20 = vadd.f32 %v405_v18, %v109_v19  ;;  %v458_v21 = vpop.f32.mrb[1].mxu0 }
  0xf1   :  { %v112_v22 = vpop.f32.mrb[2].mxu0 }
  0xf2   :  { %v113_v23 = vadd.f32 %v405_v18, %v112_v22  ;;  %v459_v24 = vpop.f32.mrb[3].mxu0  ;;  %v116_v25 = vmax.f32 %v110_v20, 0.0 }
  0xf4   :  { %v117_v26 = vmax.f32 %v113_v23, 0.0 }
  0xf6   :  { %v118_v27 = vpack.c.bf16 %v117_v26, %v116_v25 }
  0xf8   :  { %477 = vmatmul.mubr.bf16.vlgmr.msra.gmra.mrb[0].mxu1 %v118_v27 }
  0xf9   :  { %502 = vmatprep.mubr.msk.bf16.mxu1 %vm560_vm0, %v559_v0 }
 0x1cb   :  { %v224_v31 = vpop.f32.mrb[0].mxu1 }
 0x1cc   :  { %v225_v32 = vadd.f32 %v410_v30, %v224_v31  ;;  %v478_v33 = vpop.f32.mrb[1].mxu1 }
 0x1cd   :  { %v227_v34 = vpop.f32.mrb[2].mxu1 }
 0x1ce   :  { %v228_v35 = vadd.f32 %v410_v30, %v227_v34  ;;  %v479_v36 = vpop.f32.mrb[3].mxu1  ;;  %v231_v37 = vmax.f32 %v225_v32, 0.0 }
 0x1d0   :  { %v232_v38 = vmax.f32 %v228_v35, 0.0 }
 0x1d2   :  { %v233_v39 = vpack.c.bf16 %v232_v38, %v231_v37 }
 0x1d4   :  { %497 = vmatmul.mubr.bf16.vlgmr.msra.gmra.mrb[4].mxu0 %v233_v39 }
 0x2a7   :  { %v341_v43 = vpop.f32.mrb[4].mxu0 }
 0x2a8   :  { %v342_v44 = vadd.f32 %v420_v42, %v341_v43  ;;  %v498_v45 = vpop.f32.mrb[5].mxu0 }
 0x2a9   :  { %v344_v46 = vpop.f32.mrb[6].mxu0 }
 0x2aa   :  { %v345_v47 = vadd.f32 %v420_v42, %v344_v46  ;;  %v499_v48 = vpop.f32.mrb[7].mxu0  ;;  %v348_v49 = vmax.f32 %v342_v44, 0.0 }
 0x2ac   :  { %v349_v50 = vmax.f32 %v345_v47, 0.0 }
 0x2ae   :  { %v351_v51 = vpack.c.bf16 %v349_v50, %v348_v49 }
 0x2b0   :  { %501 = vmatpush3.bf16.xpose.msra.mxu1 %v351_v51 }
 0x2b7   :  { %503 = vmatmul.mubr.bf16.vlgmr.msra.gmra.mrb[4].mxu1 %v350_v52 }
 0x38a   :  { %v392_v54 = vpop.f32.mrb[4].mxu1 }
 0x38b   :  { %v393_v55 = vadd.f32 %v392_v54, %v356_v53  ;;  %v504_v56 = vpop.f32.mrb[5].mxu1 }
 0x38c   :  { %v395_v57 = vpop.f32.mrb[6].mxu1 }
 0x38d   :  { %399 = vst.msk [vmem:[%s675_s7] sm:$0xff] %vm398_vm2, %v393_v55  ;;  %v505_v58 = vpop.f32.mrb[7].mxu1 }
 0x38e   :  { %404 = vsyncpa [#allocation3], 1 }

</bundles_post_ra>
